<compile_context>
chip_gen: v6e
topology: v6e:2x2x1
jax: 0.10.0
libtpu: 0.0.40
codegen_flags: <defaults>
</compile_context>

<pallas_src>
import functools

import jax
import jax.numpy as jnp
from jax import lax
from jax.experimental import pallas as pl
from jax.experimental.pallas import tpu as pltpu


def _conv3x3_kernel(x_ref, w_ref, o_ref, *, H, W, Cin, Cout, Bg):
    """3x3 / pad=1 / no-bias conv for a group of Bg images, slab-free.

    x_ref: (Bg, Cin, H*W)   flattened NCHW activations (unpadded)
    w_ref: (9, Cout, Cin)   weight, tap-major (kh*3+kw, co, ci)
    o_ref: (Bg, Cout, H*W)  flattened NCHW output
    """
    N = H * W
    NB = Bg * N

    # Fold the batch group into the lane axis: (Bg, Cin, N) -> (Cin, Bg*N).
    # Each image occupies a 128-lane-aligned range (N = 256 = 2 vregs), so the
    # concat is just vreg placement.
    if Bg == 1:
        x = x_ref[0]
    else:
        x = jnp.concatenate([x_ref[b] for b in range(Bg)], axis=1)   # (Cin, NB)

    w = w_ref[...]                                                   # (9, Cout, Cin)

    # Image-local lane bookkeeping for the zero-padding masks (>=2-D iota),
    # computed once for the whole fused lane axis.
    lane = lax.broadcasted_iota(jnp.int32, (1, NB), 1)
    n_loc = (lane & (N - 1)) if (N & (N - 1)) == 0 else (lane % N)   # idx within image
    col = (n_loc & (W - 1)) if (W & (W - 1)) == 0 else (n_loc % W)   # column within row

    acc = jnp.zeros((Cout, NB), jnp.float32)
    for kh in range(3):
        for kw in range(3):
            dh, dw = kh - 1, kw - 1
            shift = dh * W + dw
            # Source pixel of output lane m is lane m + shift (same image
            # whenever the mask below says "valid"); a circular lane roll
            # brings it to lane m.  Wrapped / cross-image lanes are exactly
            # the lanes the masks zero out.
            tap = x if shift == 0 else pltpu.roll(x, shift=(-shift) % NB, axis=1)

            valid = None
            if dh == -1:                      # needs h >= 1
                valid = n_loc >= W
            elif dh == 1:                     # needs h <= H-2
                valid = n_loc < (H - 1) * W
            if dw == -1:                      # needs w >= 1
                c = col >= 1
                valid = c if valid is None else (valid & c)
            elif dw == 1:                     # needs w <= W-2
                c = col <= W - 2
                valid = c if valid is None else (valid & c)
            if valid is not None:
                tap = jnp.where(valid, tap, jnp.zeros_like(tap))

            t = kh * 3 + kw
            acc = acc + jnp.dot(w[t], tap, preferred_element_type=jnp.float32)

    # Un-fold the lane axis back into the batch dim with 2-vreg-aligned static
    # slices; lane-dense (Cout, N) unmasked stores.
    for b in range(Bg):
        o_ref[b, :, :] = acc[:, b * N:(b + 1) * N].astype(o_ref.dtype)


def _num_batch_groups(B):
    """1 group (single grid step) on single-TC chips; 2 groups on v7x."""
    if B < 2 or B % 2 != 0:
        return 1
    try:
        kind = jax.devices()[0].device_kind.lower()
    except Exception:
        kind = ""
    # v7x has 2 TensorCores per chip -> split the batch so both cores get work.
    return 2 if ("v7" in kind or "tpu7" in kind) else 1


def out_head_forward(x_nchw, weight_oihw, num_groups=None):
    """Forward pass equivalent to OutHead.forward (Conv2d k=3, pad=1, no bias).

    Args:
      x_nchw:      (B, Cin, H, W) float32, PyTorch NCHW layout.
      weight_oihw: (Cout, Cin, 3, 3) float32, PyTorch OIHW layout.
      num_groups:  optional override for the number of grid steps (batch split).
    Returns:
      (B, Cout, H, W) float32, NCHW layout (matches PyTorch output).
    """
    B, Cin, H, W = x_nchw.shape
    Cout = weight_oihw.shape[0]
    N = H * W

    G = _num_batch_groups(B) if num_groups is None else num_groups
    assert B % G == 0, "batch must divide the number of grid steps"
    Bg = B // G

    # Free reshape: NCHW is already contiguous as (B, Cin, H*W).
    x_flat = x_nchw.reshape(B, Cin, N)

    # One-time tiny weight rearrangement: OIHW -> (tap, co, ci).  No K padding.
    w_taps = jnp.transpose(weight_oihw, (2, 3, 0, 1)).reshape(9, Cout, Cin)

    kernel = functools.partial(_conv3x3_kernel, H=H, W=W, Cin=Cin, Cout=Cout, Bg=Bg)

    out_flat = pl.pallas_call(
        kernel,
        out_shape=jax.ShapeDtypeStruct((B, Cout, N), x_nchw.dtype),
        grid_spec=pltpu.PrefetchScalarGridSpec(
            num_scalar_prefetch=0,
            grid=(G,),                                      # 1 step (v5e/v6e) or 2 (v7x)
            in_specs=[
                pl.BlockSpec((Bg, Cin, N), lambda g: (g, 0, 0)),
                pl.BlockSpec((9, Cout, Cin), lambda g: (0, 0, 0)),
            ],
            out_specs=pl.BlockSpec((Bg, Cout, N), lambda g: (g, 0, 0)),
        ),
        compiler_params=pltpu.CompilerParams(
            dimension_semantics=("parallel",)),             # v7x: one group per core
    )(x_flat, w_taps)

    # Free reshape back to NCHW.
    return out_flat.reshape(B, Cout, H, W)


if __name__ == "__main__":
    # Small shapes consistent with the module: batch=2, in_ch=4, out_ch=8, spatial=16.
    B, Cin, Cout, H, W = 2, 4, 8, 16, 16

    key = jax.random.PRNGKey(0)
    key_x, key_w = jax.random.split(key)

    x = jax.random.normal(key_x, (B, Cin, H, W), dtype=jnp.float32)

    # Deterministic Kaiming-normal init (fan_in mode, gain=sqrt(2)) for the Conv2d weight.
    fan_in = Cin * 3 * 3
    std = (2.0 / fan_in) ** 0.5
    weight = std * jax.random.normal(key_w, (Cout, Cin, 3, 3), dtype=jnp.float32)

    out = out_head_forward(x, weight)
    out = jax.block_until_ready(out)

    # Sanity check against XLA's native conv (same semantics as PyTorch Conv2d).
    ref = jax.lax.conv_general_dilated(
        x, weight, window_strides=(1, 1), padding=((1, 1), (1, 1)),
        dimension_numbers=("NCHW", "OIHW", "NCHW"))

    assert out.shape == (B, Cout, H, W)
    err = float(jnp.max(jnp.abs(out - ref)))
    assert jnp.allclose(out, ref, atol=1e-4, rtol=1e-4), f"max abs err = {err}"
    print("KERNEL_OK")
</pallas_src>

<mosaic_0001>
module attributes {stable_mosaic.version = 11 : i64} {
  func.func @_conv3x3_kernel(%arg0: i32, %arg1: memref<2x4x256xf32, #tpu.memory_space<vmem>>, %arg2: memref<9x8x4xf32, #tpu.memory_space<vmem>>, %arg3: memref<2x8x256xf32, #tpu.memory_space<vmem>>) attributes {dimension_semantics = [#tpu.dimension_semantics<parallel>], iteration_bounds = array<i64: 1>, scalar_prefetch = 0 : i64, scratch_operands = 0 : i64, tpu.core_type = #tpu.core_type<tc>, window_params = [{transform_indices = @transform_0, window_bounds = array<i64: 2, 4, 256>}, {pipeline_mode = #tpu.pipeline_mode<synchronous>, transform_indices = @transform_1, window_bounds = array<i64: 9, 8, 4>}, {transform_indices = @transform_2, window_bounds = array<i64: 2, 8, 256>}]} {
    %c0 = arith.constant 0 : index
    %c0_0 = arith.constant 0 : index
    %c0_1 = arith.constant 0 : index
    %0 = vector.load %arg1[%c0, %c0_0, %c0_1] : memref<2x4x256xf32, #tpu.memory_space<vmem>>, vector<1x4x256xf32>
    %1 = vector.shape_cast %0 : vector<1x4x256xf32> to vector<4x256xf32>
    %c1 = arith.constant 1 : index
    %c0_2 = arith.constant 0 : index
    %c0_3 = arith.constant 0 : index
    %2 = vector.load %arg1[%c1, %c0_2, %c0_3] : memref<2x4x256xf32, #tpu.memory_space<vmem>>, vector<1x4x256xf32>
    %3 = vector.shape_cast %2 : vector<1x4x256xf32> to vector<4x256xf32>
    %4 = tpu.concatenate %1, %3 in 1 : vector<4x256xf32>, vector<4x256xf32> -> vector<4x512xf32>
    %c0_4 = arith.constant 0 : index
    %c0_5 = arith.constant 0 : index
    %c0_6 = arith.constant 0 : index
    %5 = vector.load %arg2[%c0_4, %c0_5, %c0_6] : memref<9x8x4xf32, #tpu.memory_space<vmem>>, vector<9x8x4xf32>
    %6 = tpu.iota {dimensions = array<i32: 1>} : vector<1x512xi32>
    %c255_i32 = arith.constant 255 : i32
    %7 = vector.broadcast %c255_i32 : i32 to vector<1x512xi32>
    %8 = arith.andi %6, %7 : vector<1x512xi32>
    %c15_i32 = arith.constant 15 : i32
    %9 = vector.broadcast %c15_i32 : i32 to vector<1x512xi32>
    %10 = arith.andi %8, %9 : vector<1x512xi32>
    %cst = arith.constant 0.000000e+00 : f32
    %11 = vector.broadcast %cst : f32 to vector<8x512xf32>
    %c17_i32 = arith.constant 17 : i32
    %12 = tpu.dynamic_rotate %4 by %c17_i32 dim 1 : vector<4x512xf32>, i32 -> vector<4x512xf32>
    %c16_i32 = arith.constant 16 : i32
    %13 = vector.broadcast %c16_i32 : i32 to vector<1x512xi32>
    %14 = arith.cmpi sge, %8, %13 : vector<1x512xi32>
    %c1_i32 = arith.constant 1 : i32
    %15 = vector.broadcast %c1_i32 : i32 to vector<1x512xi32>
    %16 = arith.cmpi sge, %10, %15 : vector<1x512xi32>
    %17 = arith.andi %14, %16 : vector<1x512xi1>
    %cst_7 = arith.constant 0.000000e+00 : f32
    %18 = vector.broadcast %cst_7 : f32 to vector<4x512xf32>
    %19 = vector.shape_cast %17 : vector<1x512xi1> to vector<1x512xi1>
    %20 = vector.broadcast %19 : vector<1x512xi1> to vector<4x512xi1>
    %21 = arith.select %20, %12, %18 : vector<4x512xi1>, vector<4x512xf32>
    %22 = vector.extract_strided_slice %5 {offsets = [0, 0, 0], sizes = [1, 8, 4], strides = [1, 1, 1]} : vector<9x8x4xf32> to vector<1x8x4xf32>
    %23 = vector.shape_cast %22 : vector<1x8x4xf32> to vector<8x4xf32>
    %cst_8 = arith.constant dense<0.000000e+00> : vector<8x512xf32>
    %24 = tpu.matmul %23, %21, %cst_8 {dimension_numbers = #tpu.dot_dimension_numbers<[1], [0], [0], [1], [0, 0, 1, 1], [], []>} : vector<8x4xf32>, vector<4x512xf32>, vector<8x512xf32> -> vector<8x512xf32>
    %25 = arith.addf %11, %24 : vector<8x512xf32>
    %c16_i32_9 = arith.constant 16 : i32
    %26 = tpu.dynamic_rotate %4 by %c16_i32_9 dim 1 : vector<4x512xf32>, i32 -> vector<4x512xf32>
    %c16_i32_10 = arith.constant 16 : i32
    %27 = vector.broadcast %c16_i32_10 : i32 to vector<1x512xi32>
    %28 = arith.cmpi sge, %8, %27 : vector<1x512xi32>
    %cst_11 = arith.constant 0.000000e+00 : f32
    %29 = vector.broadcast %cst_11 : f32 to vector<4x512xf32>
    %30 = vector.shape_cast %28 : vector<1x512xi1> to vector<1x512xi1>
    %31 = vector.broadcast %30 : vector<1x512xi1> to vector<4x512xi1>
    %32 = arith.select %31, %26, %29 : vector<4x512xi1>, vector<4x512xf32>
    %33 = vector.extract_strided_slice %5 {offsets = [1, 0, 0], sizes = [1, 8, 4], strides = [1, 1, 1]} : vector<9x8x4xf32> to vector<1x8x4xf32>
    %34 = vector.shape_cast %33 : vector<1x8x4xf32> to vector<8x4xf32>
    %cst_12 = arith.constant dense<0.000000e+00> : vector<8x512xf32>
    %35 = tpu.matmul %34, %32, %cst_12 {dimension_numbers = #tpu.dot_dimension_numbers<[1], [0], [0], [1], [0, 0, 1, 1], [], []>} : vector<8x4xf32>, vector<4x512xf32>, vector<8x512xf32> -> vector<8x512xf32>
    %36 = arith.addf %25, %35 : vector<8x512xf32>
    %c15_i32_13 = arith.constant 15 : i32
    %37 = tpu.dynamic_rotate %4 by %c15_i32_13 dim 1 : vector<4x512xf32>, i32 -> vector<4x512xf32>
    %c16_i32_14 = arith.constant 16 : i32
    %38 = vector.broadcast %c16_i32_14 : i32 to vector<1x512xi32>
    %39 = arith.cmpi sge, %8, %38 : vector<1x512xi32>
    %c14_i32 = arith.constant 14 : i32
    %40 = vector.broadcast %c14_i32 : i32 to vector<1x512xi32>
    %41 = arith.cmpi sle, %10, %40 : vector<1x512xi32>
    %42 = arith.andi %39, %41 : vector<1x512xi1>
    %cst_15 = arith.constant 0.000000e+00 : f32
    %43 = vector.broadcast %cst_15 : f32 to vector<4x512xf32>
    %44 = vector.shape_cast %42 : vector<1x512xi1> to vector<1x512xi1>
    %45 = vector.broadcast %44 : vector<1x512xi1> to vector<4x512xi1>
    %46 = arith.select %45, %37, %43 : vector<4x512xi1>, vector<4x512xf32>
    %47 = vector.extract_strided_slice %5 {offsets = [2, 0, 0], sizes = [1, 8, 4], strides = [1, 1, 1]} : vector<9x8x4xf32> to vector<1x8x4xf32>
    %48 = vector.shape_cast %47 : vector<1x8x4xf32> to vector<8x4xf32>
    %cst_16 = arith.constant dense<0.000000e+00> : vector<8x512xf32>
    %49 = tpu.matmul %48, %46, %cst_16 {dimension_numbers = #tpu.dot_dimension_numbers<[1], [0], [0], [1], [0, 0, 1, 1], [], []>} : vector<8x4xf32>, vector<4x512xf32>, vector<8x512xf32> -> vector<8x512xf32>
    %50 = arith.addf %36, %49 : vector<8x512xf32>
    %c1_i32_17 = arith.constant 1 : i32
    %51 = tpu.dynamic_rotate %4 by %c1_i32_17 dim 1 : vector<4x512xf32>, i32 -> vector<4x512xf32>
    %c1_i32_18 = arith.constant 1 : i32
    %52 = vector.broadcast %c1_i32_18 : i32 to vector<1x512xi32>
    %53 = arith.cmpi sge, %10, %52 : vector<1x512xi32>
    %cst_19 = arith.constant 0.000000e+00 : f32
    %54 = vector.broadcast %cst_19 : f32 to vector<4x512xf32>
    %55 = vector.shape_cast %53 : vector<1x512xi1> to vector<1x512xi1>
    %56 = vector.broadcast %55 : vector<1x512xi1> to vector<4x512xi1>
    %57 = arith.select %56, %51, %54 : vector<4x512xi1>, vector<4x512xf32>
    %58 = vector.extract_strided_slice %5 {offsets = [3, 0, 0], sizes = [1, 8, 4], strides = [1, 1, 1]} : vector<9x8x4xf32> to vector<1x8x4xf32>
    %59 = vector.shape_cast %58 : vector<1x8x4xf32> to vector<8x4xf32>
    %cst_20 = arith.constant dense<0.000000e+00> : vector<8x512xf32>
    %60 = tpu.matmul %59, %57, %cst_20 {dimension_numbers = #tpu.dot_dimension_numbers<[1], [0], [0], [1], [0, 0, 1, 1], [], []>} : vector<8x4xf32>, vector<4x512xf32>, vector<8x512xf32> -> vector<8x512xf32>
    %61 = arith.addf %50, %60 : vector<8x512xf32>
    %62 = vector.extract_strided_slice %5 {offsets = [4, 0, 0], sizes = [1, 8, 4], strides = [1, 1, 1]} : vector<9x8x4xf32> to vector<1x8x4xf32>
    %63 = vector.shape_cast %62 : vector<1x8x4xf32> to vector<8x4xf32>
    %cst_21 = arith.constant dense<0.000000e+00> : vector<8x512xf32>
    %64 = tpu.matmul %63, %4, %cst_21 {dimension_numbers = #tpu.dot_dimension_numbers<[1], [0], [0], [1], [0, 0, 1, 1], [], []>} : vector<8x4xf32>, vector<4x512xf32>, vector<8x512xf32> -> vector<8x512xf32>
    %65 = arith.addf %61, %64 : vector<8x512xf32>
    %c511_i32 = arith.constant 511 : i32
    %66 = tpu.dynamic_rotate %4 by %c511_i32 dim 1 : vector<4x512xf32>, i32 -> vector<4x512xf32>
    %c14_i32_22 = arith.constant 14 : i32
    %67 = vector.broadcast %c14_i32_22 : i32 to vector<1x512xi32>
    %68 = arith.cmpi sle, %10, %67 : vector<1x512xi32>
    %cst_23 = arith.constant 0.000000e+00 : f32
    %69 = vector.broadcast %cst_23 : f32 to vector<4x512xf32>
    %70 = vector.shape_cast %68 : vector<1x512xi1> to vector<1x512xi1>
    %71 = vector.broadcast %70 : vector<1x512xi1> to vector<4x512xi1>
    %72 = arith.select %71, %66, %69 : vector<4x512xi1>, vector<4x512xf32>
    %73 = vector.extract_strided_slice %5 {offsets = [5, 0, 0], sizes = [1, 8, 4], strides = [1, 1, 1]} : vector<9x8x4xf32> to vector<1x8x4xf32>
    %74 = vector.shape_cast %73 : vector<1x8x4xf32> to vector<8x4xf32>
    %cst_24 = arith.constant dense<0.000000e+00> : vector<8x512xf32>
    %75 = tpu.matmul %74, %72, %cst_24 {dimension_numbers = #tpu.dot_dimension_numbers<[1], [0], [0], [1], [0, 0, 1, 1], [], []>} : vector<8x4xf32>, vector<4x512xf32>, vector<8x512xf32> -> vector<8x512xf32>
    %76 = arith.addf %65, %75 : vector<8x512xf32>
    %c497_i32 = arith.constant 497 : i32
    %77 = tpu.dynamic_rotate %4 by %c497_i32 dim 1 : vector<4x512xf32>, i32 -> vector<4x512xf32>
    %c240_i32 = arith.constant 240 : i32
    %78 = vector.broadcast %c240_i32 : i32 to vector<1x512xi32>
    %79 = arith.cmpi slt, %8, %78 : vector<1x512xi32>
    %c1_i32_25 = arith.constant 1 : i32
    %80 = vector.broadcast %c1_i32_25 : i32 to vector<1x512xi32>
    %81 = arith.cmpi sge, %10, %80 : vector<1x512xi32>
    %82 = arith.andi %79, %81 : vector<1x512xi1>
    %cst_26 = arith.constant 0.000000e+00 : f32
    %83 = vector.broadcast %cst_26 : f32 to vector<4x512xf32>
    %84 = vector.shape_cast %82 : vector<1x512xi1> to vector<1x512xi1>
    %85 = vector.broadcast %84 : vector<1x512xi1> to vector<4x512xi1>
    %86 = arith.select %85, %77, %83 : vector<4x512xi1>, vector<4x512xf32>
    %87 = vector.extract_strided_slice %5 {offsets = [6, 0, 0], sizes = [1, 8, 4], strides = [1, 1, 1]} : vector<9x8x4xf32> to vector<1x8x4xf32>
    %88 = vector.shape_cast %87 : vector<1x8x4xf32> to vector<8x4xf32>
    %cst_27 = arith.constant dense<0.000000e+00> : vector<8x512xf32>
    %89 = tpu.matmul %88, %86, %cst_27 {dimension_numbers = #tpu.dot_dimension_numbers<[1], [0], [0], [1], [0, 0, 1, 1], [], []>} : vector<8x4xf32>, vector<4x512xf32>, vector<8x512xf32> -> vector<8x512xf32>
    %90 = arith.addf %76, %89 : vector<8x512xf32>
    %c496_i32 = arith.constant 496 : i32
    %91 = tpu.dynamic_rotate %4 by %c496_i32 dim 1 : vector<4x512xf32>, i32 -> vector<4x512xf32>
    %c240_i32_28 = arith.constant 240 : i32
    %92 = vector.broadcast %c240_i32_28 : i32 to vector<1x512xi32>
    %93 = arith.cmpi slt, %8, %92 : vector<1x512xi32>
    %cst_29 = arith.constant 0.000000e+00 : f32
    %94 = vector.broadcast %cst_29 : f32 to vector<4x512xf32>
    %95 = vector.shape_cast %93 : vector<1x512xi1> to vector<1x512xi1>
    %96 = vector.broadcast %95 : vector<1x512xi1> to vector<4x512xi1>
    %97 = arith.select %96, %91, %94 : vector<4x512xi1>, vector<4x512xf32>
    %98 = vector.extract_strided_slice %5 {offsets = [7, 0, 0], sizes = [1, 8, 4], strides = [1, 1, 1]} : vector<9x8x4xf32> to vector<1x8x4xf32>
    %99 = vector.shape_cast %98 : vector<1x8x4xf32> to vector<8x4xf32>
    %cst_30 = arith.constant dense<0.000000e+00> : vector<8x512xf32>
    %100 = tpu.matmul %99, %97, %cst_30 {dimension_numbers = #tpu.dot_dimension_numbers<[1], [0], [0], [1], [0, 0, 1, 1], [], []>} : vector<8x4xf32>, vector<4x512xf32>, vector<8x512xf32> -> vector<8x512xf32>
    %101 = arith.addf %90, %100 : vector<8x512xf32>
    %c495_i32 = arith.constant 495 : i32
    %102 = tpu.dynamic_rotate %4 by %c495_i32 dim 1 : vector<4x512xf32>, i32 -> vector<4x512xf32>
    %c240_i32_31 = arith.constant 240 : i32
    %103 = vector.broadcast %c240_i32_31 : i32 to vector<1x512xi32>
    %104 = arith.cmpi slt, %8, %103 : vector<1x512xi32>
    %c14_i32_32 = arith.constant 14 : i32
    %105 = vector.broadcast %c14_i32_32 : i32 to vector<1x512xi32>
    %106 = arith.cmpi sle, %10, %105 : vector<1x512xi32>
    %107 = arith.andi %104, %106 : vector<1x512xi1>
    %cst_33 = arith.constant 0.000000e+00 : f32
    %108 = vector.broadcast %cst_33 : f32 to vector<4x512xf32>
    %109 = vector.shape_cast %107 : vector<1x512xi1> to vector<1x512xi1>
    %110 = vector.broadcast %109 : vector<1x512xi1> to vector<4x512xi1>
    %111 = arith.select %110, %102, %108 : vector<4x512xi1>, vector<4x512xf32>
    %112 = vector.extract_strided_slice %5 {offsets = [8, 0, 0], sizes = [1, 8, 4], strides = [1, 1, 1]} : vector<9x8x4xf32> to vector<1x8x4xf32>
    %113 = vector.shape_cast %112 : vector<1x8x4xf32> to vector<8x4xf32>
    %cst_34 = arith.constant dense<0.000000e+00> : vector<8x512xf32>
    %114 = tpu.matmul %113, %111, %cst_34 {dimension_numbers = #tpu.dot_dimension_numbers<[1], [0], [0], [1], [0, 0, 1, 1], [], []>} : vector<8x4xf32>, vector<4x512xf32>, vector<8x512xf32> -> vector<8x512xf32>
    %115 = arith.addf %101, %114 : vector<8x512xf32>
    %116 = vector.extract_strided_slice %115 {offsets = [0, 0], sizes = [8, 256], strides = [1, 1]} : vector<8x512xf32> to vector<8x256xf32>
    %c0_35 = arith.constant 0 : index
    %c0_36 = arith.constant 0 : index
    %c0_37 = arith.constant 0 : index
    %117 = vector.load %arg3[%c0_35, %c0_36, %c0_37] : memref<2x8x256xf32, #tpu.memory_space<vmem>>, vector<1x8x256xf32>
    %118 = vector.shape_cast %117 : vector<1x8x256xf32> to vector<8x256xf32>
    %119 = vector.shape_cast %116 : vector<8x256xf32> to vector<1x8x256xf32>
    tpu.vector_store %arg3[%c0_35, %c0_36, %c0_37], %119 {strides = array<i32>} : memref<2x8x256xf32, #tpu.memory_space<vmem>>, vector<1x8x256xf32>,
    %120 = vector.extract_strided_slice %115 {offsets = [0, 256], sizes = [8, 256], strides = [1, 1]} : vector<8x512xf32> to vector<8x256xf32>
    %c1_38 = arith.constant 1 : index
    %c0_39 = arith.constant 0 : index
    %c0_40 = arith.constant 0 : index
    %121 = vector.load %arg3[%c1_38, %c0_39, %c0_40] : memref<2x8x256xf32, #tpu.memory_space<vmem>>, vector<1x8x256xf32>
    %122 = vector.shape_cast %121 : vector<1x8x256xf32> to vector<8x256xf32>
    %123 = vector.shape_cast %120 : vector<8x256xf32> to vector<1x8x256xf32>
    tpu.vector_store %arg3[%c1_38, %c0_39, %c0_40], %123 {strides = array<i32>} : memref<2x8x256xf32, #tpu.memory_space<vmem>>, vector<1x8x256xf32>,
    return
  }
  func.func @transform_0(%arg0: i32) -> (i32, i32, i32) {
    %c0_i32 = arith.constant 0 : i32
    %c0_i32_0 = arith.constant 0 : i32
    %c0_i32_1 = arith.constant 0 : i32
    return %arg0, %c0_i32, %c0_i32_0 : i32, i32, i32
  }
  func.func @transform_1(%arg0: i32) -> (i32, i32, i32) {
    %c0_i32 = arith.constant 0 : i32
    %c0_i32_0 = arith.constant 0 : i32
    %c0_i32_1 = arith.constant 0 : i32
    %c0_i32_2 = arith.constant 0 : i32
    return %c0_i32, %c0_i32_0, %c0_i32_1 : i32, i32, i32
  }
  func.func @transform_2(%arg0: i32) -> (i32, i32, i32) {
    %c0_i32 = arith.constant 0 : i32
    %c0_i32_0 = arith.constant 0 : i32
    %c0_i32_1 = arith.constant 0 : i32
    return %arg0, %c0_i32, %c0_i32_0 : i32, i32, i32
  }
}

</mosaic_0001>

<bundles_post_ra>
// kernel: tpu_custom_call.1
= control target key start
LH: loop header
LB: loop body
LE: loop exit
PB: predicated region body
PF: predicated region fallthrough
CT: control target
= control target key end

     0   :  { %s1825_s13 = smov 16   ;;  %s2192_s0 = inlined_call_operand.vmem [shape: f32[2,4,256], index: 0, kind: input, shape index: {}]   ;;  %s2193_s1 = inlined_call_operand.vmem [shape: f32[9,8,4], index: 1, kind: input, shape index: {}]   ;;  %s2194_s2 = inlined_call_operand.hbm [shape: f32[2,8,256], index: 2, kind: output, shape index: {}]  }
   0x1   :  { %v1854_v0 = vld [vmem:[%s2192_s0 + $0x8] sm:$0xff]  ;;  %v1859_v1 = vld [vmem:[%s2192_s0] sm:$0xff] }
   0x2   :  { %84 = vrot.lane.b32.xlu1 %v1854_v0, %s1825_s13  ;;  %80 = vrot.lane.b32.xlu0 %v1859_v1, %s1825_s13  ;;  %v1867_v2 = vcombine.high %v1854_v0, %v1854_v0  ;;  %v1871_v3 = vcombine.high %v1859_v1, %v1859_v1 }
   0x3   :  { %7 = vsyncpa [#allocation3], 0  ;;  %v1826_v4 = vmov 0.0   ;;  %s1827_s0 = smov 17   ;;  %s1828_s14 = smov 15   ;;  %v30_v5 = vlaneseq  ;;  %vm109_vm1 = vcmask 1043456  }
   0x4   :  { %186 = vmatprep.mubr.f32.mxu0 %v1826_v4  ;;  %257 = vmatprep.mubr.f32.mxu1 %v1826_v4  ;;  %s1829_s15 = smov 1   ;;  %s1830_s16 = smov 127   ;;  %vm105_vm4 = vcmask 31744   ;;  %v22_v27 = vld [vmem:[%s2193_s1 + $0x8] sm:$0xff]  ;;  %v21_v41 = vld [vmem:[%s2193_s1] sm:$0xff]  ;;  %v23_v55 = vld [vmem:[%s2193_s1 + $0x10] sm:$0xff] }
   0x5   :  { %s1831_s17 = smov 113   ;;  %s1832_s18 = smov 112   ;;  %v1907_v6 = vand.u32 127, %v30_v5 }
   0x6   :  { %86 = vrot.lane.b32.xlu1 %v1867_v2, %s1825_s13  ;;  %82 = vrot.lane.b32.xlu0 %v1871_v3, %s1825_s13  ;;  %s1833_s19 = smov 111  }
   0x7   :  { %v33_v7 = vadd.s32 256, %v1907_v6  ;;  %v1911_v8 = vadd.s32 128, %v1907_v6  ;;  %v35_v9 = vand.u32 255, %v1907_v6  ;;  %v1916_v12 = vadd.s32 384, %v1907_v6 }
   0x8   :  { %vm88_vm0 = vcmp.lt.s32.totalorder %v1907_v6, 16  ;;  %vm51_vm5 = vcmp.lt.s32.totalorder %v1907_v6, 17  ;;  %vm429_vm12 = vcmp.lt.s32.totalorder %v1907_v6, 15 }
   0x9   :  { %v37_v10 = vand.u32 255, %v33_v7  ;;  %v36_v11 = vand.u32 255, %v1911_v8  ;;  %vm1919_vm2 = vcmp.ge.s32.totalorder %v35_v9, 16  ;;  %v1931_v18 = vand.u32 15, %v35_v9 }
   0xa   :  { %45 = vrot.lane.b32.xlu1 %v1871_v3, %s1827_s0  ;;  %43 = vrot.lane.b32.xlu0 %v1859_v1, %s1827_s0  ;;  %v38_v19 = vand.u32 255, %v1916_v12 }
   0xb   :  { %vm1923_vm3 = vcmp.ge.s32.totalorder %v37_v10, 16  ;;  %v1929_v17 = vand.u32 15, %v36_v11  ;;  %v1934_v22 = vand.u32 15, %v37_v10  ;;  %vm60_vm7 = vcmp.ge.s32.totalorder %v1931_v18, 1 }
   0xc   :  { %v1952_v30 = vand.u32 15, %v38_v19  ;;  %vm64_vm9 = vmand %vm1919_vm2, %vm60_vm7  ;;  %vm434_vm14 = vcmp.le.s32.totalorder %v1931_v18, 14 }
   0xd   :  { %vm61_vm6 = vcmp.ge.s32.totalorder %v1929_v17, 1  ;;  %vm62_vm8 = vcmp.ge.s32.totalorder %v1934_v22, 1  ;;  %vm435_vm13 = vcmp.le.s32.totalorder %v1929_v17, 14  ;;  %vm436_vm15 = vcmp.le.s32.totalorder %v1934_v22, 14 }
   0xe   :  { %49 = vrot.lane.b32.xlu1 %v1867_v2, %s1827_s0  ;;  %47 = vrot.lane.b32.xlu0 %v1854_v0, %s1827_s0  ;;  %vm63_vm10 = vcmp.ge.s32.totalorder %v1952_v30, 1  ;;  %vm1973_vm11 = vmand %vm1923_vm3, %vm62_vm8 }
  0x12   :  { %423 = vrot.lane.b32.xlu1 %v1871_v3, %s1828_s14  ;;  %421 = vrot.lane.b32.xlu0 %v1859_v1, %s1828_s14 }
  0x16   :  { %427 = vrot.lane.b32.xlu1 %v1867_v2, %s1828_s14  ;;  %425 = vrot.lane.b32.xlu0 %v1854_v0, %s1828_s14 }
  0x1a   :  { %617 = vrot.lane.b32.xlu1 %v1871_v3, %s1829_s15  ;;  %615 = vrot.lane.b32.xlu0 %v1859_v1, %s1829_s15 }
  0x1e   :  { %621 = vrot.lane.b32.xlu1 %v1867_v2, %s1829_s15  ;;  %619 = vrot.lane.b32.xlu0 %v1854_v0, %s1829_s15 }
  0x22   :  { %960 = vrot.lane.b32.xlu1 %v1871_v3, %s1830_s16  ;;  %958 = vrot.lane.b32.xlu0 %v1859_v1, %s1830_s16 }
  0x26   :  { %964 = vrot.lane.b32.xlu1 %v1867_v2, %s1830_s16  ;;  %962 = vrot.lane.b32.xlu0 %v1854_v0, %s1830_s16 }
  0x2a   :  { %1146 = vrot.lane.b32.xlu1 %v1871_v3, %s1831_s17  ;;  %1144 = vrot.lane.b32.xlu0 %v1859_v1, %s1831_s17 }
  0x2e   :  { %1150 = vrot.lane.b32.xlu1 %v1867_v2, %s1831_s17  ;;  %1148 = vrot.lane.b32.xlu0 %v1854_v0, %s1831_s17 }
  0x32   :  { %1340 = vrot.lane.b32.xlu1 %v1871_v3, %s1832_s18  ;;  %1338 = vrot.lane.b32.xlu0 %v1859_v1, %s1832_s18 }
  0x36   :  { %1344 = vrot.lane.b32.xlu1 %v1867_v2, %s1832_s18  ;;  %1342 = vrot.lane.b32.xlu0 %v1854_v0, %s1832_s18 }
  0x3a   :  { %1526 = vrot.lane.b32.xlu1 %v1871_v3, %s1833_s19  ;;  %1524 = vrot.lane.b32.xlu0 %v1859_v1, %s1833_s19 }
  0x3e   :  { %1530 = vrot.lane.b32.xlu1 %v1867_v2, %s1833_s19  ;;  %1528 = vrot.lane.b32.xlu0 %v1854_v0, %s1833_s19 }
  0x74   :  { %v85_v13 = vpop.permute.xlu1 %84  ;;  %v81_v14 = vpop.permute.xlu0 %80 }
  0x78   :  { %v87_v20 = vpop.permute.xlu1 %86  ;;  %v83_v21 = vpop.permute.xlu0 %82 }
  0x79   :  { %v92_v23 = vsel %vm88_vm0, %v87_v20, %v81_v14  ;;  %v90_v24 = vsel %vm88_vm0, %v83_v21, %v85_v13  ;;  %v91_v25 = vsel %vm88_vm0, %v81_v14, %v83_v21  ;;  %v89_v26 = vsel %vm88_vm0, %v85_v13, %v87_v20  ;;  %vm2008_vm0 = vmand %vm1919_vm2, %vm434_vm14  ;;  %v24_v13 = vld [vmem:[%s2193_s1 + $0x18] sm:$0xff] }
  0x7a   :  { %1736 = vmatprep.subr.msk.mxu0 %vm109_vm1, %v91_v25  ;;  %1739 = vmatprep.subr.msk.mxu1 %vm109_vm1, %v89_v26  ;;  %v101_v28 = vsel %vm1919_vm2, %v92_v23, 0.0  ;;  %v103_v29 = vsel %vm1923_vm3, %v90_v24, 0.0  ;;  %vm623_vm2 = vcmp.lt.s32.totalorder %v1907_v6, 1  ;;  %v25_v23 = vld [vmem:[%s2193_s1 + $0x20] sm:$0xff] }
  0x7b   :  { %1737 = vmatpush1.msk.msra.mxu0 %vm109_vm1, %v101_v28  ;;  %1740 = vmatpush1.msk.msra.mxu1 %vm109_vm1, %v103_v29  ;;  %v26_v29 = vld [vmem:[%s2193_s1 + $0x28] sm:$0xff] }
  0x7c   :  { %v46_v31 = vpop.permute.xlu1 %45  ;;  %v44_v32 = vpop.permute.xlu0 %43  ;;  %1738 = vmatmul.mubr.msk.f32.vlgmr.msra.gmra.mxu0 %vm105_vm4, %v22_v27  ;;  %1741 = vmatmul.mubr.msk.f32.vlgmr.msra.gmra.mxu1 %vm105_vm4, %v22_v27 }
  0x7d   :  { %v54_v33 = vsel %vm51_vm5, %v44_v32, %v46_v31  ;;  %343 = vmatprep.mubr.f32.mxu0 %v1826_v4  ;;  %414 = vmatprep.mubr.f32.mxu1 %v1826_v4 }
  0x7e   :  { %v77_v34 = vsel %vm61_vm6, %v54_v33, 0.0 }
  0x7f   :  { %1742 = vmatprep.subr.msk.mxu0 %vm109_vm1, %v77_v34 }
  0x80   :  { %v50_v36 = vpop.permute.xlu1 %49  ;;  %v48_v37 = vpop.permute.xlu0 %47 }
  0x81   :  { %v55_v38 = vsel %vm51_vm5, %v50_v36, %v44_v32  ;;  %v52_v39 = vsel %vm51_vm5, %v48_v37, %v50_v36  ;;  %v53_v40 = vsel %vm51_vm5, %v46_v31, %v48_v37  ;;  %vm437_vm5 = vcmp.le.s32.totalorder %v1952_v30, 14 }
  0x82   :  { %v76_v42 = vsel %vm64_vm9, %v55_v38, 0.0  ;;  %v78_v43 = vsel %vm1973_vm11, %v53_v40, 0.0  ;;  %v79_v44 = vsel %vm63_vm10, %v52_v39, 0.0  ;;  %vm440_vm9 = vmand %vm1923_vm3, %vm436_vm15  ;;  %vm966_vm3 = vcmp.lt.s32.totalorder %v1907_v6, 127 }
  0x83   :  { %1743 = vmatpush1.msk.msra.mxu0 %vm109_vm1, %v76_v42  ;;  %1745 = vmatprep.subr.msk.mxu1 %vm109_vm1, %v79_v44  ;;  %vm2098_vm11 = vcmp.lt.s32.totalorder %v38_v19, 240  ;;  %v27_v42 = vld [vmem:[%s2193_s1 + $0x30] sm:$0xff] }
  0x84   :  { %v424_v45 = vpop.permute.xlu1 %423  ;;  %1746 = vmatpush1.msk.msra.mxu1 %vm109_vm1, %v78_v43  ;;  %v422_v46 = vpop.permute.xlu0 %421  ;;  %1744 = vmatmul.mubr.msk.f32.vlgmr.msra.gmra.mxu0 %vm105_vm4, %v21_v41 }
  0x85   :  { %v432_v47 = vsel %vm429_vm12, %v422_v46, %v424_v45  ;;  %1747 = vmatmul.mubr.msk.f32.vlgmr.msra.gmra.mxu1 %vm105_vm4, %v21_v41  ;;  %533 = vmatprep.mubr.f32.mxu0 %v1826_v4 }
  0x86   :  { %v451_v48 = vsel %vm435_vm13, %v432_v47, 0.0  ;;  %604 = vmatprep.mubr.f32.mxu1 %v1826_v4 }
  0x87   :  { %1748 = vmatprep.subr.msk.mxu0 %vm109_vm1, %v451_v48 }
  0x88   :  { %v428_v50 = vpop.permute.xlu1 %427  ;;  %v426_v51 = vpop.permute.xlu0 %425 }
  0x89   :  { %v433_v52 = vsel %vm429_vm12, %v428_v50, %v422_v46  ;;  %v430_v53 = vsel %vm429_vm12, %v426_v51, %v428_v50  ;;  %v431_v54 = vsel %vm429_vm12, %v424_v45, %v426_v51  ;;  %vm2106_vm12 = vcmp.lt.s32.totalorder %v36_v11, 240 }
  0x8a   :  { %v450_v56 = vsel %vm2008_vm0, %v433_v52, 0.0  ;;  %v452_v57 = vsel %vm440_vm9, %v431_v54, 0.0  ;;  %v453_v58 = vsel %vm437_vm5, %v430_v53, 0.0  ;;  %vm1152_vm0 = vcmp.lt.s32.totalorder %v1907_v6, 113  ;;  %vm2117_vm9 = vmand %vm2098_vm11, %vm63_vm10  ;;  %v28_v52 = vld [vmem:[%s2193_s1 + $0x38] sm:$0xff] }
  0x8b   :  { %1749 = vmatpush1.msk.msra.mxu0 %vm109_vm1, %v450_v56  ;;  %1751 = vmatprep.subr.msk.mxu1 %vm109_vm1, %v453_v58 }
  0x8c   :  { %v618_v59 = vpop.permute.xlu1 %617  ;;  %1752 = vmatpush1.msk.msra.mxu1 %vm109_vm1, %v452_v57  ;;  %v616_v60 = vpop.permute.xlu0 %615  ;;  %1750 = vmatmul.mubr.msk.f32.vlgmr.msra.gmra.mxu0 %vm105_vm4, %v23_v55 }
  0x8d   :  { %v626_v61 = vsel %vm623_vm2, %v616_v60, %v618_v59  ;;  %1753 = vmatmul.mubr.msk.f32.vlgmr.msra.gmra.mxu1 %vm105_vm4, %v23_v55  ;;  %719 = vmatprep.mubr.f32.mxu0 %v1826_v4 }
  0x8e   :  { %v637_v62 = vsel %vm61_vm6, %v626_v61, 0.0  ;;  %790 = vmatprep.mubr.f32.mxu1 %v1826_v4 }
  0x8f   :  { %1754 = vmatprep.subr.msk.mxu0 %vm109_vm1, %v637_v62 }
  0x90   :  { %v622_v63 = vpop.permute.xlu1 %621  ;;  %v620_v5 = vpop.permute.xlu0 %619 }
  0x91   :  { %v627_v7 = vsel %vm623_vm2, %v622_v63, %v616_v60  ;;  %v624_v9 = vsel %vm623_vm2, %v620_v5, %v622_v63  ;;  %v625_v10 = vsel %vm623_vm2, %v618_v59, %v620_v5  ;;  %vm1162_vm2 = vmand %vm2106_vm12, %vm61_vm6  ;;  %vm1346_vm6 = vcmp.lt.s32.totalorder %v1907_v6, 112 }
  0x92   :  { %v636_v14 = vsel %vm60_vm7, %v627_v7, 0.0  ;;  %v638_v15 = vsel %vm62_vm8, %v625_v10, 0.0  ;;  %v639_v16 = vsel %vm63_vm10, %v624_v9, 0.0  ;;  %vm1538_vm10 = vmand %vm2106_vm12, %vm435_vm13 }
  0x93   :  { %1755 = vmatpush1.msk.msra.mxu0 %vm109_vm1, %v636_v14  ;;  %1757 = vmatprep.subr.msk.mxu1 %vm109_vm1, %v639_v16 }
  0x94   :  { %v961_v20 = vpop.permute.xlu1 %960  ;;  %1758 = vmatpush1.msk.msra.mxu1 %vm109_vm1, %v638_v15  ;;  %v959_v21 = vpop.permute.xlu0 %958  ;;  %1756 = vmatmul.mubr.msk.f32.vlgmr.msra.gmra.mxu0 %vm105_vm4, %v24_v13 }
  0x95   :  { %1759 = vmatmul.mubr.msk.f32.vlgmr.msra.gmra.mxu1 %vm105_vm4, %v24_v13  ;;  %1760 = vmatprep.subr.msk.mxu0 %vm109_vm1, %v1871_v3  ;;  %v969_v24 = vsel %vm966_vm3, %v959_v21, %v961_v20 }
  0x96   :  { %1763 = vmatprep.subr.msk.mxu1 %vm109_vm1, %v1867_v2  ;;  %1761 = vmatpush1.msk.msra.mxu0 %vm109_vm1, %v1859_v1  ;;  %v979_v31 = vsel %vm434_vm14, %v969_v24, 0.0 }
  0x97   :  { %876 = vmatprep.mubr.f32.mxu0 %v1826_v4  ;;  %1764 = vmatpush1.msk.msra.mxu1 %vm109_vm1, %v1854_v0 }
  0x98   :  { %v965_v25 = vpop.permute.xlu1 %964  ;;  %v963_v26 = vpop.permute.xlu0 %962  ;;  %947 = vmatprep.mubr.f32.mxu1 %v1826_v4  ;;  %1762 = vmatmul.mubr.msk.f32.vlgmr.msra.gmra.mxu0 %vm105_vm4, %v25_v23 }
  0x99   :  { %v970_v3 = vsel %vm966_vm3, %v965_v25, %v959_v21  ;;  %v967_v27 = vsel %vm966_vm3, %v963_v26, %v965_v25  ;;  %v968_v28 = vsel %vm966_vm3, %v961_v20, %v963_v26  ;;  %1765 = vmatmul.mubr.msk.f32.vlgmr.msra.gmra.mxu1 %vm105_vm4, %v25_v23  ;;  %1062 = vmatprep.mubr.f32.mxu0 %v1826_v4 }
  0x9a   :  { %v982_v1 = vsel %vm437_vm5, %v970_v3, 0.0  ;;  %v980_v0 = vsel %vm435_vm13, %v968_v28, 0.0  ;;  %v981_v2 = vsel %vm436_vm15, %v967_v27, 0.0  ;;  %1133 = vmatprep.mubr.f32.mxu1 %v1826_v4 }
  0x9b   :  { %1766 = vmatprep.subr.msk.mxu0 %vm109_vm1, %v980_v0  ;;  %1769 = vmatprep.subr.msk.mxu1 %vm109_vm1, %v982_v1 }
  0x9c   :  { %v1147_v33 = vpop.permute.xlu1 %1146  ;;  %1767 = vmatpush1.msk.msra.mxu0 %vm109_vm1, %v979_v31  ;;  %1770 = vmatpush1.msk.msra.mxu1 %vm109_vm1, %v981_v2  ;;  %v1145_v34 = vpop.permute.xlu0 %1144 }
  0x9d   :  { %1768 = vmatmul.mubr.msk.f32.vlgmr.msra.gmra.mxu0 %vm105_vm4, %v26_v29  ;;  %1771 = vmatmul.mubr.msk.f32.vlgmr.msra.gmra.mxu1 %vm105_vm4, %v26_v29  ;;  %v1155_v8 = vsel %vm1152_vm0, %v1145_v34, %v1147_v33 }
  0x9e   :  { %1256 = vmatprep.mubr.f32.mxu0 %v1826_v4  ;;  %1327 = vmatprep.mubr.f32.mxu1 %v1826_v4  ;;  %v1173_v43 = vsel %vm60_vm7, %v1155_v8, 0.0  ;;  %vm1532_vm7 = vcmp.lt.s32.totalorder %v1907_v6, 111 }
  0xa0   :  { %v1151_v11 = vpop.permute.xlu1 %1150  ;;  %v1149_v19 = vpop.permute.xlu0 %1148 }
  0xa1   :  { %v1156_v36 = vsel %vm1152_vm0, %v1151_v11, %v1145_v34  ;;  %v1153_v37 = vsel %vm1152_vm0, %v1149_v19, %v1151_v11  ;;  %v1154_v38 = vsel %vm1152_vm0, %v1147_v33, %v1149_v19 }
  0xa2   :  { %v1176_v39 = vsel %vm2117_vm9, %v1156_v36, 0.0  ;;  %v1174_v40 = vsel %vm1162_vm2, %v1154_v38, 0.0  ;;  %v1175_v41 = vsel %vm62_vm8, %v1153_v37, 0.0  ;;  %vm2163_vm8 = vmand %vm2098_vm11, %vm437_vm5 }
  0xa3   :  { %1772 = vmatprep.subr.msk.mxu0 %vm109_vm1, %v1174_v40  ;;  %1775 = vmatprep.subr.msk.mxu1 %vm109_vm1, %v1176_v39 }
  0xa4   :  { %v1341_v44 = vpop.permute.xlu1 %1340  ;;  %1773 = vmatpush1.msk.msra.mxu0 %vm109_vm1, %v1173_v43  ;;  %1776 = vmatpush1.msk.msra.mxu1 %vm109_vm1, %v1175_v41  ;;  %v1339_v45 = vpop.permute.xlu0 %1338 }
  0xa5   :  { %1774 = vmatmul.mubr.msk.f32.vlgmr.msra.gmra.mxu0 %vm105_vm4, %v27_v42  ;;  %1777 = vmatmul.mubr.msk.f32.vlgmr.msra.gmra.mxu1 %vm105_vm4, %v27_v42  ;;  %v1349_v53 = vsel %vm1346_vm6, %v1339_v45, %v1341_v44 }
  0xa6   :  { %1442 = vmatprep.mubr.f32.mxu0 %v1826_v4  ;;  %1513 = vmatprep.mubr.f32.mxu1 %v1826_v4 }
  0xa8   :  { %v1345_v46 = vpop.permute.xlu1 %1344  ;;  %v1343_v47 = vpop.permute.xlu0 %1342 }
  0xa9   :  { %v1350_v48 = vsel %vm1346_vm6, %v1345_v46, %v1339_v45  ;;  %v1348_v49 = vsel %vm1346_vm6, %v1341_v44, %v1343_v47  ;;  %v1347_v54 = vsel %vm1346_vm6, %v1343_v47, %v1345_v46 }
  0xaa   :  { %v1362_v50 = vsel %vm2098_vm11, %v1350_v48, 0.0  ;;  %v1360_v51 = vsel %vm2106_vm12, %v1348_v49, 0.0 }
  0xab   :  { %1778 = vmatprep.subr.msk.mxu0 %vm109_vm1, %v1360_v51  ;;  %1781 = vmatprep.subr.msk.mxu1 %vm109_vm1, %v1362_v50 }
  0xac   :  { %v1527_v55 = vpop.permute.xlu1 %1526  ;;  %1779 = vmatpush1.msk.msra.mxu0 %vm109_vm1, %v1349_v53  ;;  %1782 = vmatpush1.msk.msra.mxu1 %vm109_vm1, %v1347_v54  ;;  %v1525_v56 = vpop.permute.xlu0 %1524 }
  0xad   :  { %1780 = vmatmul.mubr.msk.f32.vlgmr.msra.gmra.mxu0 %vm105_vm4, %v28_v52  ;;  %1783 = vmatmul.mubr.msk.f32.vlgmr.msra.gmra.mxu1 %vm105_vm4, %v28_v52  ;;  %v1535_v6 = vsel %vm1532_vm7, %v1525_v56, %v1527_v55 }
  0xae   :  { %1632 = vmatprep.mubr.f32.mxu0 %v1826_v4  ;;  %1703 = vmatprep.mubr.f32.mxu1 %v1826_v4  ;;  %v29_v4 = vld [vmem:[%s2193_s1 + $0x40] sm:$0xff]  ;;  %v1549_v17 = vsel %vm434_vm14, %v1535_v6, 0.0  ;;  %s1834_s1 = smov [#allocation2]  }
  0xaf   :  { %s1724_s10 = sshll.u32 %s1834_s1, 4  ;;  %s1725_s10 = int_to_ptr.vmem [resolvable:$true] %s1724_s10 }
  0xb0   :  { %v1531_v58 = vpop.permute.xlu1 %1530  ;;  %v1529_v59 = vpop.permute.xlu0 %1528  ;;  %s1803_s11 = scalar_lea.vmem %s1725_s10, 512  ;;  %p1808_p1 = scmp.lt.s32.totalorder %s1725_s10, %s1725_s10 }
  0xb1   :  { %v1536_v60 = vsel %vm1532_vm7, %v1531_v58, %v1525_v56  ;;  %v1533_v30 = vsel %vm1532_vm7, %v1529_v59, %v1531_v58  ;;  %v1534_v61 = vsel %vm1532_vm7, %v1527_v55, %v1529_v59  ;;  %p1804_p0 = scmp.ne.s32.totalorder %s1725_s10, %s1803_s11  ;;  %p1809_p2 = scmp.lt.s32.totalorder %s1803_s11, %s1803_s11 }
  0xb2   :  { %v1552_v62 = vsel %vm2163_vm8, %v1536_v60, 0.0  ;;  %v1550_v63 = vsel %vm1538_vm10, %v1534_v61, 0.0  ;;  %v1551_v5 = vsel %vm436_vm15, %v1533_v30, 0.0 }
  0xb3   :  { %1784 = vmatprep.subr.msk.mxu0 %vm109_vm1, %v1550_v63  ;;  %1787 = vmatprep.subr.msk.mxu1 %vm109_vm1, %v1552_v62  ;;  %p1810_p3 = por %p1809_p2, %p1808_p1 }
  0xb4   :  { %1785 = vmatpush1.msk.msra.mxu0 %vm109_vm1, %v1549_v17  ;;  %1788 = vmatpush1.msk.msra.mxu1 %vm109_vm1, %v1551_v5 }
  0xb5   :  { %1786 = vmatmul.mubr.msk.f32.vlgmr.msra.gmra.mxu0 %vm105_vm4, %v29_v4  ;;  %1789 = vmatmul.mubr.msk.f32.vlgmr.msra.gmra.mxu1 %vm105_vm4, %v29_v4  ;;  %p1811_p4 = pnand %p1810_p3, %p1804_p0 }
 0x13c   :  { %v188_v22 = vpop.f32.mrf.mxu0  ;;  %v259_v7 = vpop.f32.mrf.mxu1 }
 0x13e   :  { %v190_v9 = vpop.f32.mrf.mxu0  ;;  %v261_v10 = vpop.f32.mrf.mxu1 }
 0x144   :  { %v345_v13 = vpop.f32.mrf.mxu0 }
 0x145   :  { %v416_v14 = vpop.f32.mrf.mxu1  ;;  %v346_v2 = vadd.f32 %v345_v13, %v188_v22 }
 0x146   :  { %v347_v18 = vpop.f32.mrf.mxu0  ;;  %v417_v29 = vadd.f32 %v416_v14, %v259_v7 }
 0x147   :  { %v418_v15 = vpop.f32.mrf.mxu1  ;;  %v348_v33 = vadd.f32 %v347_v18, %v190_v9 }
 0x148   :  { %v419_v34 = vadd.f32 %v418_v15, %v261_v10 }
 0x14c   :  { %v535_v16 = vpop.f32.mrf.mxu0 }
 0x14d   :  { %v606_v20 = vpop.f32.mrf.mxu1  ;;  %v611_v35 = vadd.f32 %v535_v16, %v346_v2 }
 0x14e   :  { %v537_v21 = vpop.f32.mrf.mxu0  ;;  %v613_v12 = vadd.f32 %v606_v20, %v417_v29 }
 0x14f   :  { %v608_v23 = vpop.f32.mrf.mxu1  ;;  %v612_v19 = vadd.f32 %v537_v21, %v348_v33 }
 0x150   :  { %v614_v36 = vadd.f32 %v608_v23, %v419_v34 }
 0x154   :  { %v721_v24 = vpop.f32.mrf.mxu0 }
 0x155   :  { %v792_v25 = vpop.f32.mrf.mxu1  ;;  %v797_v37 = vadd.f32 %v721_v24, %v611_v35 }
 0x156   :  { %v723_v26 = vpop.f32.mrf.mxu0  ;;  %v799_v38 = vadd.f32 %v792_v25, %v613_v12 }
 0x157   :  { %v794_v3 = vpop.f32.mrf.mxu1  ;;  %v798_v41 = vadd.f32 %v723_v26, %v612_v19 }
 0x158   :  { %v878_v27 = vpop.f32.mrf.mxu0  ;;  %v800_v42 = vadd.f32 %v794_v3, %v614_v36 }
 0x159   :  { %v949_v28 = vpop.f32.mrf.mxu1  ;;  %v954_v43 = vadd.f32 %v878_v27, %v797_v37 }
 0x15a   :  { %v880_v1 = vpop.f32.mrf.mxu0  ;;  %v956_v44 = vadd.f32 %v949_v28, %v799_v38 }
 0x15b   :  { %v951_v0 = vpop.f32.mrf.mxu1  ;;  %v955_v49 = vadd.f32 %v880_v1, %v798_v41 }
 0x15c   :  { %v957_v50 = vadd.f32 %v951_v0, %v800_v42 }
 0x15d   :  { %v1064_v31 = vpop.f32.mrf.mxu0  ;;  %v1135_v32 = vpop.f32.mrf.mxu1 }
 0x15e   :  { %v1140_v51 = vadd.f32 %v1064_v31, %v954_v43  ;;  %v1142_v52 = vadd.f32 %v1135_v32, %v956_v44 }
 0x15f   :  { %v1066_v8 = vpop.f32.mrf.mxu0  ;;  %v1137_v11 = vpop.f32.mrf.mxu1 }
 0x160   :  { %v1141_v53 = vadd.f32 %v1066_v8, %v955_v49  ;;  %v1143_v54 = vadd.f32 %v1137_v11, %v957_v50 }
 0x165   :  { %v1258_v39 = vpop.f32.mrf.mxu0  ;;  %v1329_v40 = vpop.f32.mrf.mxu1 }
 0x166   :  { %v1334_v55 = vadd.f32 %v1258_v39, %v1140_v51  ;;  %v1336_v56 = vadd.f32 %v1329_v40, %v1142_v52 }
 0x167   :  { %v1260_v45 = vpop.f32.mrf.mxu0  ;;  %v1331_v46 = vpop.f32.mrf.mxu1 }
 0x168   :  { %v1335_v58 = vadd.f32 %v1260_v45, %v1141_v53  ;;  %v1337_v59 = vadd.f32 %v1331_v46, %v1143_v54 }
 0x16d   :  { %v1444_v47 = vpop.f32.mrf.mxu0  ;;  %v1515_v48 = vpop.f32.mrf.mxu1 }
 0x16e   :  { %v1520_v60 = vadd.f32 %v1444_v47, %v1334_v55  ;;  %v1522_v30 = vadd.f32 %v1515_v48, %v1336_v56 }
 0x16f   :  { %v1446_v57 = vpop.f32.mrf.mxu0  ;;  %v1517_v6 = vpop.f32.mrf.mxu1 }
 0x170   :  { %v1521_v63 = vadd.f32 %v1446_v57, %v1335_v58  ;;  %v1523_v5 = vadd.f32 %v1517_v6, %v1337_v59 }
 0x175   :  { %v1634_v61 = vpop.f32.mrf.mxu0  ;;  %v1705_v62 = vpop.f32.mrf.mxu1 }
 0x176   :  { %v1710_v4 = vadd.f32 %v1634_v61, %v1520_v60  ;;  %v1712_v17 = vadd.f32 %v1705_v62, %v1522_v30 }
 0x177   :  { %v1636_v22 = vpop.f32.mrf.mxu0  ;;  %v1707_v7 = vpop.f32.mrf.mxu1 }
 0x178   :  { %1714 = vst [vmem:[#allocation2] sm:$0xff] %v1710_v4  ;;  %1717 = vst [vmem:[#allocation2 + $0x10] sm:$0xff] %v1712_v17  ;;  %v1711_v9 = vadd.f32 %v1636_v22, %v1521_v63  ;;  %v1713_v10 = vadd.f32 %v1707_v7, %v1523_v5 }
 0x17a   :  { %1715 = vst [vmem:[#allocation2 + $0x8] sm:$0xff] %v1711_v9  ;;  %1718 = vst [vmem:[#allocation2 + $0x18] sm:$0xff] %v1713_v10 }
 0x17b   :  { %1814 = shalt.err (!%p1811_p4)
}
 0x17c   :  { %s1835_s12 = smov 256  }
 0x17d   :  { %1730 = dma.vmem_to_hbm [thread:$0]  %s1725_s10, 512, %s2194_s2, [#allocation3], %s1835_s12, %s1835_s12, %s1825_s13  }
 0x17e   :  { %1823 = dma.done.wait [#allocation3], 512  }
 0x17f   :  { %1824 = vsyncadd [#allocation3], 4294966784 }
 0x180   :  { %1734 = vsyncpa [#allocation3], 1 }

</bundles_post_ra>
